<compile_context>
chip_gen: v6e
topology: v6e:2x2x1
jax: 0.10.0
libtpu: 0.0.40
codegen_flags: <defaults>
</compile_context>

<pallas_src>
import math

import jax
import jax.numpy as jnp
from jax.experimental import pallas as pl
from jax.experimental.pallas import tpu as pltpu

_VMEM_LIMIT_BYTES = 48 * 1024 * 1024  # fits v5e/v6e (128 MiB) and v7x (64 MiB)


def _support_kernel(x_ref, w_ref, s_ref):
    # support row-tile = X_tile @ W  (bf16 operands, f32 MXU accumulation)
    s_ref[...] = jnp.dot(
        x_ref[...], w_ref[...], preferred_element_type=jnp.float32
    ).astype(s_ref.dtype)


def _aggregate_kernel(adj_ref, s_ref, b_ref, o_ref, acc_ref):
    # output row-tile = sum_k adj[i, k] @ support[k] ; bias added at finalize.
    k = pl.program_id(1)

    @pl.when(k == 0)
    def _():
        acc_ref[...] = jnp.zeros_like(acc_ref)

    acc_ref[...] += jnp.dot(
        adj_ref[...], s_ref[...], preferred_element_type=jnp.float32)

    @pl.when(k == pl.num_programs(1) - 1)
    def _():
        o_ref[...] = (acc_ref[...] + b_ref[...]).astype(o_ref.dtype)


def _pick_tile(n, preferred):
    """Largest preferred tile that divides n, else the full extent."""
    for t in preferred:
        if n % t == 0:
            return t
    return n  # full extent always satisfies the (8,128) block rule
    # TODO(synk): for huge, awkwardly-sized N, pad instead of falling back
    #             to a full-extent tile (VMEM pressure).


def graph_convolution(x, adj, weight, bias=None, *,
                      compute_dtype=jnp.bfloat16, tm=None, tk=None):
    """Pallas implementation of GraphConvolution.forward."""
    N, Fin = x.shape
    Fout = weight.shape[1]
    assert adj.shape == (N, N)
    out_dtype = x.dtype

    if bias is None:
        bias = jnp.zeros((Fout,), jnp.float32)
    bias2d = bias.reshape(1, Fout).astype(jnp.float32)

    # Zero-pad the first matmul's contraction dim to a multiple of 128 lanes
    # (numerically a no-op; keeps X loads and MXU K-dim full width).
    fin_pad = max(128, -(-Fin // 128) * 128)
    if fin_pad != Fin:
        x = jnp.pad(x, ((0, 0), (0, fin_pad - Fin)))
        weight = jnp.pad(weight, ((0, fin_pad - Fin), (0, 0)))

    x_c = x.astype(compute_dtype)
    w_c = weight.astype(compute_dtype)
    adj_c = adj.astype(compute_dtype)

    # Row tile of the output / adj (MXU M dim): 256 for big N, full N if small.
    if tm is None:
        tm = _pick_tile(N, (256, 128, 64, 32, 16, 8))
    # Reduction tile over adj columns / support rows (bounds VMEM for large N).
    if tk is None:
        tk = N if N <= 1024 else _pick_tile(N, (512, 256, 128))
    assert N % tm == 0 and N % tk == 0

    cparams = pltpu.CompilerParams(
        dimension_semantics=("parallel",),
        vmem_limit_bytes=_VMEM_LIMIT_BYTES)

    # ---- Phase 1: support = X @ W (computed exactly once) -------------------
    support = pl.pallas_call(
        _support_kernel,
        out_shape=jax.ShapeDtypeStruct((N, Fout), compute_dtype),
        grid_spec=pltpu.PrefetchScalarGridSpec(
            num_scalar_prefetch=0,
            grid=(N // tm,),
            in_specs=[
                pl.BlockSpec((tm, fin_pad), lambda i: (i, 0)),
                pl.BlockSpec((fin_pad, Fout), lambda i: (0, 0)),
            ],
            out_specs=pl.BlockSpec((tm, Fout), lambda i: (i, 0)),
        ),
        compiler_params=cparams,
    )(x_c, w_c)

    # ---- Phase 2: output = adj @ support + bias (K-tiled accumulation) ------
    cparams2 = pltpu.CompilerParams(
        dimension_semantics=("parallel", "arbitrary"),
        vmem_limit_bytes=_VMEM_LIMIT_BYTES)

    out = pl.pallas_call(
        _aggregate_kernel,
        out_shape=jax.ShapeDtypeStruct((N, Fout), out_dtype),
        grid_spec=pltpu.PrefetchScalarGridSpec(
            num_scalar_prefetch=0,
            grid=(N // tm, N // tk),
            in_specs=[
                pl.BlockSpec((tm, tk), lambda i, k: (i, k)),      # adj tile
                pl.BlockSpec((tk, Fout), lambda i, k: (k, 0)),    # support slab
                pl.BlockSpec((1, Fout), lambda i, k: (0, 0)),     # bias
            ],
            out_specs=pl.BlockSpec((tm, Fout), lambda i, k: (i, 0)),
            scratch_shapes=[pltpu.VMEM((tm, Fout), jnp.float32)],
        ),
        compiler_params=cparams2,
    )(adj_c, support, bias2d)

    return out


if __name__ == "__main__":
    # Small, tile-friendly sizes: N nodes, in/out feature dims.
    N, IN_FEATURES, OUT_FEATURES = 128, 64, 128

    key = jax.random.PRNGKey(0)
    k_x, k_adj, k_w, k_b = jax.random.split(key, 4)

    # Deterministic parameter init mirroring reset_parameters():
    # uniform(-stdv, stdv) with stdv = 1/sqrt(out_features)
    stdv = 1.0 / math.sqrt(OUT_FEATURES)
    weight = jax.random.uniform(
        k_w, (IN_FEATURES, OUT_FEATURES), jnp.float32, minval=-stdv, maxval=stdv)
    bias = jax.random.uniform(
        k_b, (OUT_FEATURES,), jnp.float32, minval=-stdv, maxval=stdv)

    # Example inputs: node features and (dense) row-normalized adjacency.
    x = jax.random.normal(k_x, (N, IN_FEATURES), jnp.float32)
    adj_raw = jax.random.uniform(k_adj, (N, N), jnp.float32)
    adj = adj_raw / jnp.sum(adj_raw, axis=-1, keepdims=True)

    out = graph_convolution(x, adj, weight, bias)
    out = jax.block_until_ready(out)

    # Pure-JAX f32 reference; tolerance loosened for the bf16 compute path.
    ref = adj @ (x @ weight) + bias[None, :]
    assert out.shape == (N, OUT_FEATURES)
    assert jnp.allclose(out, ref, atol=2e-2, rtol=2e-2), "mismatch vs reference"

    print("KERNEL_OK")
</pallas_src>

<mosaic_0001>
module attributes {stable_mosaic.version = 11 : i64} {
  func.func @_support_kernel(%arg0: i32, %arg1: memref<128x128xbf16, #tpu.memory_space<vmem>>, %arg2: memref<128x128xbf16, #tpu.memory_space<vmem>>, %arg3: memref<128x128xbf16, #tpu.memory_space<vmem>>) attributes {dimension_semantics = [#tpu.dimension_semantics<parallel>], iteration_bounds = array<i64: 1>, scalar_prefetch = 0 : i64, scratch_operands = 0 : i64, tpu.core_type = #tpu.core_type<tc>, window_params = [{transform_indices = @transform_0, window_bounds = array<i64: 128, 128>}, {pipeline_mode = #tpu.pipeline_mode<synchronous>, transform_indices = @transform_1, window_bounds = array<i64: 128, 128>}, {transform_indices = @transform_2, window_bounds = array<i64: 128, 128>}]} {
    %c0 = arith.constant 0 : index
    %c0_0 = arith.constant 0 : index
    %0 = vector.load %arg1[%c0, %c0_0] : memref<128x128xbf16, #tpu.memory_space<vmem>>, vector<128x128xbf16>
    %c0_1 = arith.constant 0 : index
    %c0_2 = arith.constant 0 : index
    %1 = vector.load %arg2[%c0_1, %c0_2] : memref<128x128xbf16, #tpu.memory_space<vmem>>, vector<128x128xbf16>
    %cst = arith.constant dense<0.000000e+00> : vector<128x128xf32>
    %2 = tpu.matmul %0, %1, %cst {dimension_numbers = #tpu.dot_dimension_numbers<[1], [0], [0], [1], [0, 0, 1, 1], [], []>} : vector<128x128xbf16>, vector<128x128xbf16>, vector<128x128xf32> -> vector<128x128xf32>
    %3 = arith.truncf %2 : vector<128x128xf32> to vector<128x128xbf16>
    %c0_3 = arith.constant 0 : index
    %c0_4 = arith.constant 0 : index
    %4 = vector.load %arg3[%c0_3, %c0_4] : memref<128x128xbf16, #tpu.memory_space<vmem>>, vector<128x128xbf16>
    tpu.vector_store %arg3[%c0_3, %c0_4], %3 {strides = array<i32>} : memref<128x128xbf16, #tpu.memory_space<vmem>>, vector<128x128xbf16>,
    return
  }
  func.func @transform_0(%arg0: i32) -> (i32, i32) {
    %c0_i32 = arith.constant 0 : i32
    %c0_i32_0 = arith.constant 0 : i32
    return %arg0, %c0_i32 : i32, i32
  }
  func.func @transform_1(%arg0: i32) -> (i32, i32) {
    %c0_i32 = arith.constant 0 : i32
    %c0_i32_0 = arith.constant 0 : i32
    %c0_i32_1 = arith.constant 0 : i32
    return %c0_i32, %c0_i32_0 : i32, i32
  }
  func.func @transform_2(%arg0: i32) -> (i32, i32) {
    %c0_i32 = arith.constant 0 : i32
    %c0_i32_0 = arith.constant 0 : i32
    return %arg0, %c0_i32 : i32, i32
  }
}

</mosaic_0001>

<bundles_post_ra>
// kernel: tpu_custom_call.1
= control target key start
LH: loop header
LB: loop body
LE: loop exit
PB: predicated region body
PF: predicated region fallthrough
CT: control target
= control target key end

     0   :  { %7 = vsyncpa [#allocation3], 0  ;;  %s648_s0 = inlined_call_operand.hbm [shape: bf16[128,128], index: 0, kind: input, shape index: {}]   ;;  %s649_s1 = inlined_call_operand.hbm [shape: bf16[128,128], index: 1, kind: input, shape index: {}]   ;;  %s650_s2 = inlined_call_operand.hbm [shape: bf16[128,128], index: 2, kind: output, shape index: {}]  }
   0x1   :  { %8 = vsyncpa [#allocation6], 0 }
   0x2   :  { %9 = vsyncpa [#allocation4], 0  ;;  %s610_s9 = smov [#allocation2]  }
   0x3   :  { %s15_s10 = sshll.u32 %s610_s9, 4  ;;  %s16_s10 = int_to_ptr.vmem [resolvable:$true] %s15_s10 }
   0x4   :  { %s552_s11 = scalar_lea.vmem %s16_s10, 1024  ;;  %p557_p1 = scmp.lt.s32.totalorder %s16_s10, %s16_s10 }
   0x5   :  { %p553_p0 = scmp.ne.s32.totalorder %s16_s10, %s552_s11  ;;  %p558_p2 = scmp.lt.s32.totalorder %s552_s11, %s552_s11 }
   0x7   :  { %p559_p3 = por %p558_p2, %p557_p1 }
   0x9   :  { %p560_p4 = pnand %p559_p3, %p553_p0 }
   0xb   :  { %563 = shalt.err (!%p560_p4)
}
   0xc   :  { %s611_s12 = smov 64   ;;  %s612_s13 = smov 4  }
   0xd   :  { %21 = dma.hbm_to_vmem [thread:$0]  %s648_s0, 1024, %s16_s10, [#allocation3], %s611_s12, %s611_s12, %s612_s13  }
   0xe   :  { %s613_s16 = smov [#allocation5]  }
   0xf   :  { %s27_s17 = sshll.u32 %s613_s16, 4  ;;  %s28_s17 = int_to_ptr.vmem [resolvable:$true] %s27_s17 }
  0x10   :  { %s572_s18 = scalar_lea.vmem %s28_s17, 1024  ;;  %p577_p6 = scmp.lt.s32.totalorder %s28_s17, %s28_s17 }
  0x11   :  { %p573_p5 = scmp.ne.s32.totalorder %s28_s17, %s572_s18  ;;  %p578_p7 = scmp.lt.s32.totalorder %s572_s18, %s572_s18 }
  0x13   :  { %p579_p8 = por %p578_p7, %p577_p6 }
  0x15   :  { %p580_p9 = pnand %p579_p8, %p573_p5 }
  0x17   :  { %583 = shalt.err (!%p580_p9)
}
  0x18   :  { %33 = dma.hbm_to_vmem [thread:$0]  %s649_s1, 1024, %s28_s17, [#allocation6], %s611_s12, %s611_s12, %s612_s13  }
  0x19   :  { %604 = dma.done.wait [#allocation3], 1024  }
  0x1a   :  { %605 = vsyncadd [#allocation3], 4294966272 }
  0x1b   :  { %606 = dma.done.wait [#allocation6], 1024  }
  0x1c   :  { %607 = vsyncadd [#allocation6], 4294966272  ;;  %v528_v0 = vld [vmem:[#allocation5 + $0x38] sm:$0xff]   ;;  %v529_v1 = vld [vmem:[#allocation5 + $0x30] sm:$0xff]   ;;  %s614_s0 = smov [#allocation7]  }
  0x1d   :  { %475 = vmatprep.subr.bf16.mxu0 %v528_v0  ;;  %507 = vmatprep.subr.bf16.mxu1 %v528_v0  ;;  %v530_v2 = vld [vmem:[#allocation5 + $0x28] sm:$0xff]   ;;  %v531_v3 = vld [vmem:[#allocation5 + $0x20] sm:$0xff]   ;;  %v532_v6 = vld [vmem:[#allocation5 + $0x18] sm:$0xff]   ;;  %s351_s1 = sshll.u32 %s614_s0, 4  ;;  %s352_s1 = int_to_ptr.vmem [resolvable:$true] %s351_s1 }
  0x1e   :  { %476 = vmatpush3.bf16.msra.mxu0 %v528_v0  ;;  %515 = vmatpush3.bf16.msra.mxu1 %v528_v0  ;;  %v536_v4 = vld [vmem:[#allocation2] sm:$0xff]   ;;  %v533_v7 = vld [vmem:[#allocation5 + $0x10] sm:$0xff]   ;;  %v534_v8 = vld [vmem:[#allocation5 + $0x8] sm:$0xff]   ;;  %s584_s21 = scalar_lea.vmem %s352_s1, 1024  ;;  %p589_p11 = scmp.lt.s32.totalorder %s352_s1, %s352_s1 }
  0x1f   :  { %477 = vmatprep.subr.bf16.mxu0 %v529_v1  ;;  %508 = vmatprep.subr.bf16.mxu1 %v529_v1  ;;  %v537_v5 = vld [vmem:[#allocation2 + $0x20] sm:$0xff]   ;;  %v538_v10 = vld [vmem:[#allocation2 + $0x8] sm:$0xff]   ;;  %v540_v12 = vld [vmem:[#allocation2 + $0x10] sm:$0xff]   ;;  %p585_p10 = scmp.ne.s32.totalorder %s352_s1, %s584_s21  ;;  %p590_p12 = scmp.lt.s32.totalorder %s584_s21, %s584_s21 }
  0x20   :  { %491 = vmatprep.mubr.bf16.mxu0 %v536_v4  ;;  %499 = vmatprep.mubr.bf16.mxu1 %v537_v5  ;;  %v535_v9 = vld [vmem:[#allocation5] sm:$0xff]   ;;  %v539_v11 = vld [vmem:[#allocation2 + $0x28] sm:$0xff]   ;;  %v541_v13 = vld [vmem:[#allocation2 + $0x30] sm:$0xff]  }
  0x21   :  { %v542_v14 = vld [vmem:[#allocation2 + $0x18] sm:$0xff]   ;;  %p591_p13 = por %p590_p12, %p589_p11 }
  0x22   :  { %478 = vmatpush3.bf16.msra.mxu0 %v529_v1  ;;  %516 = vmatpush3.bf16.msra.mxu1 %v529_v1  ;;  %v543_v15 = vld [vmem:[#allocation2 + $0x38] sm:$0xff]  }
  0x23   :  { %479 = vmatprep.subr.bf16.mxu0 %v530_v2  ;;  %509 = vmatprep.subr.bf16.mxu1 %v530_v2  ;;  %p592_p0 = pnand %p591_p13, %p585_p10 }
  0x26   :  { %480 = vmatpush3.bf16.msra.mxu0 %v530_v2  ;;  %517 = vmatpush3.bf16.msra.mxu1 %v530_v2 }
  0x27   :  { %481 = vmatprep.subr.bf16.mxu0 %v531_v3  ;;  %510 = vmatprep.subr.bf16.mxu1 %v531_v3 }
  0x2a   :  { %482 = vmatpush3.bf16.msra.mxu0 %v531_v3  ;;  %518 = vmatpush3.bf16.msra.mxu1 %v531_v3 }
  0x2b   :  { %483 = vmatprep.subr.bf16.mxu0 %v532_v6  ;;  %511 = vmatprep.subr.bf16.mxu1 %v532_v6 }
  0x2e   :  { %484 = vmatpush3.bf16.msra.mxu0 %v532_v6  ;;  %519 = vmatpush3.bf16.msra.mxu1 %v532_v6 }
  0x2f   :  { %485 = vmatprep.subr.bf16.mxu0 %v533_v7  ;;  %512 = vmatprep.subr.bf16.mxu1 %v533_v7 }
  0x32   :  { %486 = vmatpush3.bf16.msra.mxu0 %v533_v7  ;;  %520 = vmatpush3.bf16.msra.mxu1 %v533_v7 }
  0x33   :  { %487 = vmatprep.subr.bf16.mxu0 %v534_v8  ;;  %513 = vmatprep.subr.bf16.mxu1 %v534_v8 }
  0x36   :  { %488 = vmatpush3.bf16.msra.mxu0 %v534_v8  ;;  %521 = vmatpush3.bf16.msra.mxu1 %v534_v8 }
  0x37   :  { %489 = vmatprep.subr.bf16.mxu0 %v535_v9  ;;  %514 = vmatprep.subr.bf16.mxu1 %v535_v9 }
  0x3a   :  { %490 = vmatpush3.bf16.msra.mxu0 %v535_v9  ;;  %522 = vmatpush3.bf16.msra.mxu1 %v535_v9 }
  0x3d   :  { %492 = vmatmul.mubr.bf16.vlgmr.msra.gmra.mxu0 %v538_v10  ;;  %500 = vmatmul.mubr.bf16.vlgmr.msra.gmra.mxu1 %v539_v11 }
  0x3e   :  { %495 = vmatprep.mubr.bf16.mxu0 %v540_v12  ;;  %503 = vmatprep.mubr.bf16.mxu1 %v541_v13 }
  0x45   :  { %496 = vmatmul.mubr.bf16.gmra.mxu0 %v542_v14  ;;  %504 = vmatmul.mubr.bf16.gmra.mxu1 %v543_v15 }
  0xfd   :  { %v493_v16 = vpop.f32.mrf.mxu0  ;;  %v501_v17 = vpop.f32.mrf.mxu1 }
  0xff   :  { %v203_v18 = vpop.f32.mrf.mxu0  ;;  %v235_v19 = vpop.f32.mrf.mxu1 }
 0x101   :  { %v494_v20 = vpop.f32.mrf.mxu0  ;;  %v502_v21 = vpop.f32.mrf.mxu1 }
 0x102   :  { %v420_v22 = vpack.c.bf16 %v494_v20, %v493_v16  ;;  %v440_v23 = vpack.c.bf16 %v502_v21, %v501_v17 }
 0x103   :  { %v206_v24 = vpop.f32.mrf.mxu0  ;;  %v238_v25 = vpop.f32.mrf.mxu1 }
 0x104   :  { %452 = vst [vmem:[#allocation7 + $0x8] sm:$0xff] %v420_v22   ;;  %456 = vst [vmem:[#allocation7 + $0x28] sm:$0xff] %v440_v23   ;;  %v415_v26 = vpack.c.bf16 %v206_v24, %v203_v18  ;;  %v435_v27 = vpack.c.bf16 %v238_v25, %v235_v19 }
 0x105   :  { %v497_v28 = vpop.f32.mrf.mxu0  ;;  %v505_v29 = vpop.f32.mrf.mxu1 }
 0x106   :  { %416 = vst [vmem:[#allocation7] sm:$0xff] %v415_v26   ;;  %455 = vst [vmem:[#allocation7 + $0x20] sm:$0xff] %v435_v27  }
 0x107   :  { %v219_v30 = vpop.f32.mrf.mxu0  ;;  %v251_v31 = vpop.f32.mrf.mxu1 }
 0x109   :  { %v498_v32 = vpop.f32.mrf.mxu0  ;;  %v506_v33 = vpop.f32.mrf.mxu1 }
 0x10a   :  { %v430_v34 = vpack.c.bf16 %v498_v32, %v497_v28  ;;  %v450_v35 = vpack.c.bf16 %v506_v33, %v505_v29 }
 0x10b   :  { %v222_v36 = vpop.f32.mrf.mxu0  ;;  %v254_v37 = vpop.f32.mrf.mxu1 }
 0x10c   :  { %454 = vst [vmem:[#allocation7 + $0x18] sm:$0xff] %v430_v34   ;;  %458 = vst [vmem:[#allocation7 + $0x38] sm:$0xff] %v450_v35   ;;  %v425_v38 = vpack.c.bf16 %v222_v36, %v219_v30  ;;  %v445_v39 = vpack.c.bf16 %v254_v37, %v251_v31 }
 0x10e   :  { %453 = vst [vmem:[#allocation7 + $0x10] sm:$0xff] %v425_v38   ;;  %457 = vst [vmem:[#allocation7 + $0x30] sm:$0xff] %v445_v39  }
 0x10f   :  { %595 = shalt.err (!%p592_p0)
}
 0x110   :  { %357 = dma.vmem_to_hbm [thread:$0]  %s352_s1, 1024, %s650_s2, [#allocation4], %s611_s12, %s611_s12, %s612_s13  }
 0x111   :  { %608 = dma.done.wait [#allocation4], 1024  }
 0x112   :  { %609 = vsyncadd [#allocation4], 4294966272 }
 0x113   :  { %361 = vsyncpa [#allocation3], 1 }
 0x114   :  { %362 = vsyncpa [#allocation6], 1 }
 0x115   :  { %363 = vsyncpa [#allocation4], 1 }

</bundles_post_ra>
